<compile_context>
chip_gen: v7x
topology: tpu7x:2x2x1
jax: 0.10.0
libtpu: 0.0.40
codegen_flags: <defaults>
</compile_context>

<pallas_src>
import math
import functools

import jax
import jax.numpy as jnp
from jax import lax
from jax.experimental import pallas as pl
from jax.experimental.pallas import tpu as pltpu


# ----------------------------------------------------------------------------
# Tunables.
# ----------------------------------------------------------------------------
# Resident (one-hot MXU) path does O(tile * Vpad * D) MAC per tile, so it is
# only worth it for small vocabularies; the tight gate also bounds the
# (double-buffered) table VMEM footprint (important on v5e's 16 MiB scoped
# default and on v5e's slower MXU).
_RESIDENT_MAX_TABLE_BYTES = 2 * 1024 * 1024   # gate on the *padded* table
_RESIDENT_MAX_VOCAB = 1024
# 256-wide one-hot chunks: full-width MXU passes on v6e/v7x (256x256 MXU);
# on v5e (4x128x128) each chunk simply becomes two 128-wide passes.
_VOCAB_CHUNK = 256
# Per-pallas_call VMEM budget used to auto-size the token tile; kept under the
# most restrictive scoped-VMEM default (16 MiB on v5e).
_VMEM_BUDGET = 12 * 1024 * 1024
# Scalar-prefetched ids live in SMEM (1-D arrays pad to next_pow2(4N) bytes);
# chunk the outer call so SMEM never blows up at production batch*seq.
_MAX_TOKENS_PER_CALL = 65536
# Row-DMA descriptors issued per scalar-loop iteration in the gather kernel.
_DMA_ISSUE_UNROLL = 8


def _round_up(x, m):
    return ((x + m - 1) // m) * m


# --------------------------------------------------------------------------
# Strategy (a): VMEM-resident table, chunked one-hot MXU gather (small vocab).
# --------------------------------------------------------------------------
def _embed_resident_kernel(ids_ref, emb_ref, out_ref, *, scale, vc, n_chunks):
    # ids_ref: (tile, 1) int32 in VMEM; emb_ref: (vpad, D) resident table.
    idx = ids_ref[...]                                           # (tile, 1)
    tile = out_ref.shape[0]
    lane_iota = lax.broadcasted_iota(jnp.int32, (tile, vc), 1)   # hoisted
    acc0 = jnp.zeros(out_ref.shape, jnp.float32)

    def body(c, acc):
        start = pl.multiple_of(c * vc, vc)
        chunk = emb_ref[pl.ds(start, vc), :]                     # (vc, D)
        onehot = (lane_iota == (idx - c * vc)).astype(chunk.dtype)
        return acc + jnp.dot(onehot, chunk, preferred_element_type=jnp.float32)

    acc = lax.fori_loop(0, n_chunks, body, acc0)
    out_ref[...] = (acc * scale).astype(out_ref.dtype)


# --------------------------------------------------------------------------
# Strategy (b): HBM table, cross-tile software-pipelined row-DMA gather.
# --------------------------------------------------------------------------
def _embed_gather_kernel(ids_ref, emb_hbm, out_ref, rows_vmem, sems, *,
                         scale, tile, unroll):
    """Step t: issue row DMAs for tile t+1 into the other slot, then wait for
    this tile's rows (issued at step t-1, or in the prologue for t == 0),
    scale and store.  All SMEM id reads happen before the DMA wait (a wait
    breaks SMEM sst->sld forwarding)."""
    t = pl.program_id(0)
    nt = pl.num_programs(0)
    slot = t % 2
    other = 1 - slot

    def issue_tile(tile_idx, dst_slot):
        base = tile_idx * tile

        @pl.loop(0, tile // unroll)
        def _(g):
            r0 = g * unroll
            for u in range(unroll):          # static unroll: several descriptors
                r = r0 + u                   # per scalar-loop iteration
                row = ids_ref[base + r]
                pltpu.make_async_copy(
                    emb_hbm.at[pl.ds(row, 1), :],
                    rows_vmem.at[dst_slot, pl.ds(r, 1), :],
                    sems.at[dst_slot],
                ).start()

    # Prologue: nothing was prefetched for the very first tile.
    @pl.when(t == 0)
    def _():
        issue_tile(0, 0)

    # Prefetch next tile's rows while this tile's DMAs drain / compute runs.
    @pl.when(t + 1 < nt)
    def _():
        issue_tile(t + 1, other)

    # All row DMAs for this slot signal one semaphore; a single wait whose
    # destination spans the whole (tile, D) slot consumes exactly the sum of
    # their byte counts.  The src operand is just a same-shaped placeholder
    # (this descriptor is never started; the wait only uses dst size + sem).
    pltpu.make_async_copy(rows_vmem.at[other], rows_vmem.at[slot],
                          sems.at[slot]).wait()

    out_ref[...] = (rows_vmem[slot].astype(jnp.float32) * scale).astype(out_ref.dtype)


# --------------------------------------------------------------------------
# Wrapper
# --------------------------------------------------------------------------
def _choose_tile(n_tok, D, table_itemsize, out_itemsize, resident,
                 table_buf_bytes, granule):
    if resident:
        avail = _VMEM_BUDGET - table_buf_bytes
        # out x2 pipeline buffers + f32 accumulator + one-hot row + ids
        per_row = D * (2 * out_itemsize + 4) + _VOCAB_CHUNK * 4 + 8
    else:
        avail = _VMEM_BUDGET
        # out x2 pipeline buffers + (2, tile, D) rows scratch
        per_row = D * (2 * out_itemsize + 2 * table_itemsize)
    avail = max(avail, per_row * granule)
    tile = (avail // per_row) // granule * granule
    tile = min(tile, 1024)                       # per-step overhead amortized
    tile = min(tile, _round_up(n_tok, granule))
    return max(granule, tile)


def _compiler_params(semantics, vmem_est):
    limit = None
    if vmem_est > _VMEM_BUDGET:   # only when a user-forced tile exceeds budget
        limit = min(max(int(vmem_est * 3 // 2), 32 * 1024 * 1024),
                    64 * 1024 * 1024)
    return pltpu.CompilerParams(dimension_semantics=semantics,
                                vmem_limit_bytes=limit)


def _embed_chunk(flat_ids, emb_table, *, scale, out_dtype, token_tile,
                 force_gather):
    n_tok = flat_ids.shape[0]
    V, D = emb_table.shape
    table_itemsize = emb_table.dtype.itemsize
    out_itemsize = jnp.dtype(out_dtype).itemsize
    granule = max(8, 32 // min(out_itemsize, table_itemsize))

    vpad = _round_up(V, _VOCAB_CHUNK)
    padded_table_bytes = vpad * D * table_itemsize
    use_resident = (not force_gather
                    and padded_table_bytes <= _RESIDENT_MAX_TABLE_BYTES
                    and V <= _RESIDENT_MAX_VOCAB)
    table_buf_bytes = 2 * padded_table_bytes if use_resident else 0

    if token_tile is None:
        tile = _choose_tile(n_tok, D, table_itemsize, out_itemsize,
                            use_resident, table_buf_bytes, granule)
    else:
        tile = min(_round_up(token_tile, granule), _round_up(n_tok, granule))

    n_pad = _round_up(n_tok, tile)
    n_tiles = n_pad // tile
    ids_pad = jnp.pad(flat_ids.astype(jnp.int32), (0, n_pad - n_tok))

    if use_resident:
        emb_p = emb_table if vpad == V else jnp.pad(
            emb_table, ((0, vpad - V), (0, 0)))
        ids2d = ids_pad.reshape(n_pad, 1)
        kernel = functools.partial(_embed_resident_kernel, scale=scale,
                                   vc=_VOCAB_CHUNK,
                                   n_chunks=vpad // _VOCAB_CHUNK)
        vmem_est = (table_buf_bytes + 2 * tile * D * out_itemsize
                    + tile * D * 4 + tile * _VOCAB_CHUNK * 4 + 2 * tile * 4)
        out_flat = pl.pallas_call(
            kernel,
            out_shape=jax.ShapeDtypeStruct((n_pad, D), out_dtype),
            grid_spec=pltpu.PrefetchScalarGridSpec(
                num_scalar_prefetch=0,
                grid=(n_tiles,),
                in_specs=[
                    pl.BlockSpec((tile, 1), lambda i: (i, 0)),   # token-id tile
                    # Constant index_map: the table is fetched once and stays
                    # resident.  TODO(synk): pipeline_mode=pl.Buffered(1) would
                    # drop its second VMEM buffer; kept default for lowering
                    # robustness (tight vocab gate bounds the waste).
                    pl.BlockSpec((vpad, D), lambda i: (0, 0)),
                ],
                out_specs=pl.BlockSpec((tile, D), lambda i: (i, 0)),
            ),
            compiler_params=_compiler_params(("parallel",), vmem_est),
            cost_estimate=pl.CostEstimate(
                flops=2 * n_pad * vpad * D + n_pad * D,
                transcendentals=0,
                bytes_accessed=(padded_table_bytes + n_pad * 4
                                + n_pad * D * out_itemsize)),
        )(ids2d, emb_p)
    else:
        unroll = _DMA_ISSUE_UNROLL if tile % _DMA_ISSUE_UNROLL == 0 else 1
        kernel = functools.partial(_embed_gather_kernel, scale=scale,
                                   tile=tile, unroll=unroll)
        vmem_est = 2 * tile * D * out_itemsize + 2 * tile * D * table_itemsize
        out_flat = pl.pallas_call(
            kernel,
            out_shape=jax.ShapeDtypeStruct((n_pad, D), out_dtype),
            grid_spec=pltpu.PrefetchScalarGridSpec(
                num_scalar_prefetch=1,                          # ids -> SMEM
                grid=(n_tiles,),
                in_specs=[pl.BlockSpec(memory_space=pl.ANY)],   # table in HBM
                out_specs=pl.BlockSpec((tile, D), lambda i, ids_sref: (i, 0)),
                scratch_shapes=[
                    pltpu.VMEM((2, tile, D), emb_table.dtype),  # double buffer
                    pltpu.SemaphoreType.DMA((2,)),              # one agg sem/slot
                ],
            ),
            # Cross-step carried scratch (prefetched rows) -> this axis must
            # execute sequentially (measured parallel-vs-arbitrary delta ~0).
            compiler_params=_compiler_params(("arbitrary",), vmem_est),
            cost_estimate=pl.CostEstimate(
                flops=n_pad * D,
                transcendentals=0,
                bytes_accessed=(n_pad * D * table_itemsize
                                + n_pad * D * out_itemsize + n_pad * 4)),
        )(ids_pad, emb_table)

    return out_flat[:n_tok]


def input_embeddings(ids, emb_table, *, out_dtype=jnp.float32, token_tile=None,
                     force_gather=False,
                     max_tokens_per_call=_MAX_TOKENS_PER_CALL):
    """Pallas equivalent of InputEmbeddings.forward: Embedding(ids) * sqrt(D).

    ids: int array of any shape with values in [0, V) (no in-kernel bounds
    check, same contract as torch.nn.Embedding).  Returns ids.shape + (D,)
    in `out_dtype` (f32 default; pass bf16 to halve output-writeback traffic).
    """
    V, D = emb_table.shape
    scale = float(math.sqrt(D))
    flat_ids = ids.reshape(-1)
    n_tok = flat_ids.shape[0]

    parts = []
    for start in range(0, n_tok, max_tokens_per_call):
        chunk = flat_ids[start:start + max_tokens_per_call]
        parts.append(_embed_chunk(chunk, emb_table, scale=scale,
                                  out_dtype=out_dtype, token_tile=token_tile,
                                  force_gather=force_gather))
    out = parts[0] if len(parts) == 1 else jnp.concatenate(parts, axis=0)
    return out.reshape(ids.shape + (D,))


if __name__ == "__main__":
    d_model = 128
    vocab_size = 64
    batch, seq = 2, 8

    key = jax.random.PRNGKey(0)
    k_emb, k_ids = jax.random.split(key)

    # Deterministic synthetic parameters (nn.Embedding weight ~ N(0, 1)).
    emb_table = jax.random.normal(k_emb, (vocab_size, d_model), dtype=jnp.float32)
    ids = jax.random.randint(k_ids, (batch, seq), 0, vocab_size, dtype=jnp.int32)

    ref = jnp.take(emb_table, ids, axis=0) * math.sqrt(d_model)

    # Resident-table (one-hot MXU) path — selected for this vocab size.
    out_res = jax.block_until_ready(input_embeddings(ids, emb_table))
    assert out_res.shape == (batch, seq, d_model)
    assert jnp.allclose(out_res, ref, rtol=1e-5, atol=1e-4), "resident path mismatch"

    # Manual-DMA gather path (large-vocab strategy), forced to exercise it.
    out_dma = jax.block_until_ready(
        input_embeddings(ids, emb_table, force_gather=True))
    assert jnp.allclose(out_dma, ref, rtol=1e-5, atol=1e-4), "gather path mismatch"

    # Gather path with >1 grid step to exercise the cross-tile DMA pipeline.
    out_dma2 = jax.block_until_ready(
        input_embeddings(ids, emb_table, force_gather=True, token_tile=8))
    assert jnp.allclose(out_dma2, ref, rtol=1e-5, atol=1e-4), "pipelined gather mismatch"

    # bf16 output option (scale in f32, store bf16).
    out_bf16 = jax.block_until_ready(
        input_embeddings(ids, emb_table, out_dtype=jnp.bfloat16))
    assert out_bf16.dtype == jnp.bfloat16
    assert jnp.allclose(out_bf16.astype(jnp.float32), ref, rtol=2e-2, atol=2e-1)

    print("KERNEL_OK")
</pallas_src>

<mosaic_0001>
module attributes {stable_mosaic.version = 11 : i64} {
  func.func @_embed_resident_kernel(%arg0: i32, %arg1: memref<16x1xi32, #tpu.memory_space<vmem>>, %arg2: memref<256x128xf32, #tpu.memory_space<vmem>>, %arg3: memref<16x128xf32, #tpu.memory_space<vmem>>) attributes {dimension_semantics = [#tpu.dimension_semantics<parallel>], iteration_bounds = array<i64: 1>, scalar_prefetch = 0 : i64, scratch_operands = 0 : i64, tpu.core_type = #tpu.core_type<tc>, window_params = [{transform_indices = @transform_0, window_bounds = array<i64: 16, 1>}, {pipeline_mode = #tpu.pipeline_mode<synchronous>, transform_indices = @transform_1, window_bounds = array<i64: 256, 128>}, {transform_indices = @transform_2, window_bounds = array<i64: 16, 128>}]} {
    %c0 = arith.constant 0 : index
    %c0_0 = arith.constant 0 : index
    %0 = vector.load %arg1[%c0, %c0_0] : memref<16x1xi32, #tpu.memory_space<vmem>>, vector<16x1xi32>
    %1 = tpu.iota {dimensions = array<i32: 1>} : vector<16x256xi32>
    %cst = arith.constant 0.000000e+00 : f32
    %2 = vector.broadcast %cst : f32 to vector<16x128xf32>
    %c0_i32 = arith.constant 0 : i32
    %c256_i32 = arith.constant 256 : i32
    %3 = arith.muli %c0_i32, %c256_i32 : i32
    %4 = tpu.assume_multiple %3, 256 : i32
    %5 = arith.index_cast %4 : i32 to index
    %c0_1 = arith.constant 0 : index
    %6 = vector.load %arg2[%5, %c0_1] : memref<256x128xf32, #tpu.memory_space<vmem>>, vector<256x128xf32>
    %c256_i32_2 = arith.constant 256 : i32
    %7 = arith.muli %c0_i32, %c256_i32_2 : i32
    %8 = vector.broadcast %7 : i32 to vector<16x1xi32>
    %9 = arith.subi %0, %8 : vector<16x1xi32>
    %10 = vector.broadcast %9 : vector<16x1xi32> to vector<16x256xi32>
    %11 = arith.cmpi eq, %1, %10 : vector<16x256xi32>
    %12 = arith.extui %11 : vector<16x256xi1> to vector<16x256xi32>
    %13 = arith.sitofp %12 : vector<16x256xi32> to vector<16x256xf32>
    %cst_3 = arith.constant dense<0.000000e+00> : vector<16x128xf32>
    %14 = tpu.matmul %13, %6, %cst_3 {dimension_numbers = #tpu.dot_dimension_numbers<[1], [0], [0], [1], [0, 0, 1, 1], [], []>} : vector<16x256xf32>, vector<256x128xf32>, vector<16x128xf32> -> vector<16x128xf32>
    %15 = arith.addf %2, %14 : vector<16x128xf32>
    %c1_i32 = arith.constant 1 : i32
    %cst_4 = arith.constant 11.3137083 : f32
    %16 = vector.broadcast %cst_4 : f32 to vector<16x128xf32>
    %17 = arith.mulf %15, %16 : vector<16x128xf32>
    %c0_5 = arith.constant 0 : index
    %c0_6 = arith.constant 0 : index
    %18 = vector.load %arg3[%c0_5, %c0_6] : memref<16x128xf32, #tpu.memory_space<vmem>>, vector<16x128xf32>
    tpu.vector_store %arg3[%c0_5, %c0_6], %17 {strides = array<i32>} : memref<16x128xf32, #tpu.memory_space<vmem>>, vector<16x128xf32>,
    return
  }
  func.func @transform_0(%arg0: i32) -> (i32, i32) {
    %c0_i32 = arith.constant 0 : i32
    %c0_i32_0 = arith.constant 0 : i32
    return %arg0, %c0_i32 : i32, i32
  }
  func.func @transform_1(%arg0: i32) -> (i32, i32) {
    %c0_i32 = arith.constant 0 : i32
    %c0_i32_0 = arith.constant 0 : i32
    %c0_i32_1 = arith.constant 0 : i32
    return %c0_i32, %c0_i32_0 : i32, i32
  }
  func.func @transform_2(%arg0: i32) -> (i32, i32) {
    %c0_i32 = arith.constant 0 : i32
    %c0_i32_0 = arith.constant 0 : i32
    return %arg0, %c0_i32 : i32, i32
  }
}

</mosaic_0001>

<bundles_post_ra>
// kernel: tpu_custom_call.1
= control target key start
LH: loop header
LB: loop body
LE: loop exit
PB: predicated region body
PF: predicated region fallthrough
CT: control target
= control target key end

     0   :  { %7 = vsyncpa [#allocation3], 0  ;;  %s383_s0 = inlined_call_operand.vmem [shape: s32[16,1], index: 0, kind: input, shape index: {}]   ;;  %s384_s1 = inlined_call_operand.hbm [shape: f32[256,128], index: 1, kind: input, shape index: {}]   ;;  %s385_s2 = inlined_call_operand.hbm [shape: f32[16,128], index: 2, kind: output, shape index: {}]  }
   0x1   :  { %8 = vsyncpa [#allocation4], 0  ;;  %s326_s9 = smov [#allocation2]   ;;  %s278_s13 = scalar_lea.hbm %s384_s1, 4096 }
   0x2   :  { %s16_s10 = sshll.u32 %s326_s9, 4  ;;  %p279_p0 = scmp.ne.s32.totalorder %s384_s1, %s278_s13  ;;  %s17_s10 = int_to_ptr.vmem [resolvable:$true] %s16_s10 }
   0x3   :  { %p282_p1 = scmp.lt.u32.totalorder %s278_s13, %s384_s1 }
   0x5   :  { %p284_p2 = pnand %p282_p1, %p279_p0 }
   0x7   :  { %287 = shalt.err (!%p284_p2)
}
   0x8   :  { %s288_s18 = scalar_lea.vmem %s17_s10, 4096  ;;  %p293_p4 = scmp.lt.s32.totalorder %s17_s10, %s17_s10 }
   0x9   :  { %p289_p3 = scmp.ne.s32.totalorder %s17_s10, %s288_s18  ;;  %p294_p5 = scmp.lt.s32.totalorder %s288_s18, %s288_s18 }
   0xb   :  { %p295_p6 = por %p294_p5, %p293_p4 }
   0xd   :  { %p296_p7 = pnand %p295_p6, %p289_p3 }
   0xf   :  { %299 = shalt.err (!%p296_p7)
}
  0x10   :  { %s327_s19 = smov 128   ;;  %s328_s20 = smov 8  }
  0x11   :  { %22 = dma.hbm_to_vmem [thread:$0]  %s384_s1, 4096, %s17_s10, [#allocation3], %s327_s19, %s327_s19, %s328_s20  }
  0x12   :  { %322 = dma.done.wait [#allocation3], 4096  }
  0x13   :  { %323 = vsyncadd [#allocation3], 4294963200  ;;  %v329_v0 = vmov 0   ;;  %v26_v1 = vld [vmem:[%s383_s0] sm:$0xff]  ;;  %v27_v2 = vld [vmem:[%s383_s0 + $0x8] sm:$0xff]  ;;  %v28_v51 = vlaneseq  ;;  %v330_v55 = vmov 1.0  }
  0x14   :  { %277 = vset.pattern.permute.xlu0 %v329_v0  ;;  %v47_v3 = vld [vmem:[#allocation2 + $0x80] sm:$0xff]  ;;  %v48_v4 = vld [vmem:[#allocation2 + $0x88] sm:$0xff]  ;;  %v49_v9 = vld [vmem:[#allocation2 + $0x90] sm:$0xff]  ;;  %s331_s0 = smov [#allocation5]  }
  0x15   :  { %64 = vperm.xlu0 %277, %v26_v1   ;;  %v31_v5 = vld [vmem:[#allocation2] sm:$0xff]  ;;  %v32_v6 = vld [vmem:[#allocation2 + $0x8] sm:$0xff]  ;;  %v223_v7 = vpack.c.bf16 %v48_v4, %v47_v3  ;;  %v50_v10 = vld [vmem:[#allocation2 + $0x98] sm:$0xff]  ;;  %v29_v52 = vand.u32 127, %v28_v51  ;;  %s165_s1 = sshll.u32 %s331_s0, 4  ;;  %s166_s1 = int_to_ptr.vmem [resolvable:$true] %s165_s1 }
  0x16   :  { %v225_v8 = vpack.c.bf16 %v32_v6, %v31_v5  ;;  %v33_v11 = vld [vmem:[#allocation2 + $0x10] sm:$0xff]  ;;  %v227_v12 = vpack.c.bf16 %v50_v10, %v49_v9  ;;  %v34_v13 = vld [vmem:[#allocation2 + $0x18] sm:$0xff]  ;;  %v51_v14 = vld [vmem:[#allocation2 + $0xa0] sm:$0xff]  ;;  %s300_s27 = scalar_lea.vmem %s166_s1, 256  ;;  %p305_p9 = scmp.lt.s32.totalorder %s166_s1, %s166_s1 }
  0x17   :  { %v52_v15 = vld [vmem:[#allocation2 + $0xa8] sm:$0xff]  ;;  %224 = vmatprep.subr.bf16.mxu0 %v223_v7  ;;  %255 = vmatprep.subr.bf16.mxu1 %v223_v7  ;;  %v229_v16 = vpack.c.bf16 %v34_v13, %v33_v11  ;;  %v35_v18 = vld [vmem:[#allocation2 + $0x20] sm:$0xff]  ;;  %v53_v20 = vld [vmem:[#allocation2 + $0xb0] sm:$0xff]  ;;  %v30_v53 = vadd.s32 128, %v29_v52  ;;  %p301_p8 = scmp.ne.s32.totalorder %s166_s1, %s300_s27  ;;  %p306_p10 = scmp.lt.s32.totalorder %s300_s27, %s300_s27 }
  0x18   :  { %226 = vmatpush3.bf16.msra.mxu0 %v225_v8  ;;  %263 = vmatpush3.bf16.msra.mxu1 %v225_v8  ;;  %v231_v17 = vpack.c.bf16 %v52_v15, %v51_v14  ;;  %v36_v19 = vld [vmem:[#allocation2 + $0x28] sm:$0xff]  ;;  %v54_v21 = vld [vmem:[#allocation2 + $0xb8] sm:$0xff]  ;;  %v37_v24 = vld [vmem:[#allocation2 + $0x30] sm:$0xff] }
  0x19   :  { %67 = vperm.xlu0 %277, %v27_v2   ;;  %228 = vmatprep.subr.bf16.mxu0 %v227_v12  ;;  %v233_v22 = vpack.c.bf16 %v36_v19, %v35_v18  ;;  %v235_v23 = vpack.c.bf16 %v54_v21, %v53_v20  ;;  %v38_v25 = vld [vmem:[#allocation2 + $0x38] sm:$0xff]  ;;  %v55_v26 = vld [vmem:[#allocation2 + $0xc0] sm:$0xff]  ;;  %v56_v27 = vld [vmem:[#allocation2 + $0xc8] sm:$0xff]  ;;  %p307_p11 = por %p306_p10, %p305_p9 }
  0x1a   :  { %256 = vmatprep.subr.bf16.mxu1 %v227_v12  ;;  %v237_v28 = vpack.c.bf16 %v38_v25, %v37_v24  ;;  %v239_v29 = vpack.c.bf16 %v56_v27, %v55_v26  ;;  %v39_v30 = vld [vmem:[#allocation2 + $0x40] sm:$0xff]  ;;  %v40_v31 = vld [vmem:[#allocation2 + $0x48] sm:$0xff]  ;;  %v57_v32 = vld [vmem:[#allocation2 + $0xd0] sm:$0xff] }
  0x1b   :  { %v58_v33 = vld [vmem:[#allocation2 + $0xd8] sm:$0xff]  ;;  %v241_v34 = vpack.c.bf16 %v40_v31, %v39_v30  ;;  %v41_v36 = vld [vmem:[#allocation2 + $0x50] sm:$0xff]  ;;  %v59_v38 = vld [vmem:[#allocation2 + $0xe0] sm:$0xff]  ;;  %p308_p12 = pnand %p307_p11, %p301_p8 }
  0x1c   :  { %230 = vmatpush3.bf16.msra.mxu0 %v229_v16  ;;  %264 = vmatpush3.bf16.msra.mxu1 %v229_v16  ;;  %v243_v35 = vpack.c.bf16 %v58_v33, %v57_v32  ;;  %v42_v37 = vld [vmem:[#allocation2 + $0x58] sm:$0xff]  ;;  %v60_v39 = vld [vmem:[#allocation2 + $0xe8] sm:$0xff]  ;;  %v43_v42 = vld [vmem:[#allocation2 + $0x60] sm:$0xff] }
  0x1d   :  { %232 = vmatprep.subr.bf16.mxu0 %v231_v17  ;;  %257 = vmatprep.subr.bf16.mxu1 %v231_v17  ;;  %v245_v40 = vpack.c.bf16 %v42_v37, %v41_v36  ;;  %v247_v41 = vpack.c.bf16 %v60_v39, %v59_v38  ;;  %v44_v43 = vld [vmem:[#allocation2 + $0x68] sm:$0xff]  ;;  %v61_v44 = vld [vmem:[#allocation2 + $0xf0] sm:$0xff]  ;;  %v62_v45 = vld [vmem:[#allocation2 + $0xf8] sm:$0xff] }
  0x1e   :  { %v249_v46 = vpack.c.bf16 %v44_v43, %v43_v42  ;;  %v251_v47 = vpack.c.bf16 %v62_v45, %v61_v44  ;;  %v45_v48 = vld [vmem:[#allocation2 + $0x70] sm:$0xff]  ;;  %v46_v49 = vld [vmem:[#allocation2 + $0x78] sm:$0xff] }
  0x1f   :  { %v253_v50 = vpack.c.bf16 %v46_v49, %v45_v48 }
  0x20   :  { %234 = vmatpush3.bf16.msra.mxu0 %v233_v22  ;;  %265 = vmatpush3.bf16.msra.mxu1 %v233_v22 }
  0x21   :  { %236 = vmatprep.subr.bf16.mxu0 %v235_v23  ;;  %258 = vmatprep.subr.bf16.mxu1 %v235_v23 }
  0x24   :  { %238 = vmatpush3.bf16.msra.mxu0 %v237_v28  ;;  %266 = vmatpush3.bf16.msra.mxu1 %v237_v28 }
  0x25   :  { %240 = vmatprep.subr.bf16.mxu0 %v239_v29  ;;  %259 = vmatprep.subr.bf16.mxu1 %v239_v29 }
  0x28   :  { %242 = vmatpush3.bf16.msra.mxu0 %v241_v34  ;;  %267 = vmatpush3.bf16.msra.mxu1 %v241_v34 }
  0x29   :  { %244 = vmatprep.subr.bf16.mxu0 %v243_v35  ;;  %260 = vmatprep.subr.bf16.mxu1 %v243_v35 }
  0x2c   :  { %246 = vmatpush3.bf16.msra.mxu0 %v245_v40  ;;  %268 = vmatpush3.bf16.msra.mxu1 %v245_v40 }
  0x2d   :  { %248 = vmatprep.subr.bf16.mxu0 %v247_v41  ;;  %261 = vmatprep.subr.bf16.mxu1 %v247_v41 }
  0x30   :  { %250 = vmatpush3.bf16.msra.mxu0 %v249_v46  ;;  %269 = vmatpush3.bf16.msra.mxu1 %v249_v46 }
  0x31   :  { %252 = vmatprep.subr.bf16.mxu0 %v251_v47  ;;  %262 = vmatprep.subr.bf16.mxu1 %v251_v47 }
  0x34   :  { %254 = vmatpush3.bf16.msra.mxu0 %v253_v50  ;;  %270 = vmatpush3.bf16.msra.mxu1 %v253_v50 }
  0x94   :  { %v65_v54 = vpop.permute.xlu0 %64 }
  0x95   :  { %vm69_vm0 = vcmp.eq.s32.totalorder %v29_v52, %v65_v54  ;;  %vm70_vm1 = vcmp.eq.s32.totalorder %v30_v53, %v65_v54 }
  0x96   :  { %181 = vmatprep.mubr.msk.f32.mxu0 %vm70_vm1, %v330_v55 }
  0x97   :  { %182 = vmatmul.mubr.msk.f32.vlgmr.msra.gmra.mrb[0].mxu0 %vm69_vm0, %v330_v55 }
  0x98   :  { %v68_v56 = vpop.permute.xlu0 %67 }
  0x99   :  { %vm71_vm2 = vcmp.eq.s32.totalorder %v29_v52, %v68_v56  ;;  %vm72_vm3 = vcmp.eq.s32.totalorder %v30_v53, %v68_v56 }
  0x9a   :  { %183 = vmatprep.mubr.msk.f32.mxu1 %vm72_vm3, %v330_v55 }
  0x9b   :  { %184 = vmatmul.mubr.msk.f32.vlgmr.msra.gmra.mrb[0].mxu1 %vm71_vm2, %v330_v55 }
 0x16a   :  { %v217_v57 = vpop.f32.mrb[0].mxu0 }
 0x16b   :  { %v218_v58 = vpop.f32.mrb[1].mxu0 }
 0x16c   :  { %v219_v59 = vadd.f32 %v218_v58, %v217_v57 }
 0x16e   :  { %v156_v60 = vmul.f32 11.313708, %v219_v59  ;;  %v220_v61 = vpop.f32.mrb[0].mxu1 }
 0x16f   :  { %v221_v62 = vpop.f32.mrb[1].mxu1 }
 0x170   :  { %158 = vst [vmem:[#allocation5] sm:$0xff] %v156_v60  ;;  %v222_v63 = vadd.f32 %v221_v62, %v220_v61 }
 0x172   :  { %v157_v0 = vmul.f32 11.313708, %v222_v63 }
 0x174   :  { %159 = vst [vmem:[#allocation5 + $0x8] sm:$0xff] %v157_v0 }
 0x175   :  { %311 = shalt.err (!%p308_p12)
}
 0x176   :  { %s312_s30 = scalar_lea.hbm %s385_s2, 256 }
 0x177   :  { %p313_p13 = scmp.ne.s32.totalorder %s385_s2, %s312_s30  ;;  %p316_p0 = scmp.lt.u32.totalorder %s312_s30, %s385_s2 }
 0x179   :  { %p318_p1 = pnand %p316_p0, %p313_p13 }
 0x17b   :  { %321 = shalt.err (!%p318_p1)
}
 0x17c   :  { %171 = dma.vmem_to_hbm [thread:$0]  %s166_s1, 256, %s385_s2, [#allocation4], %s327_s19, %s327_s19, %s328_s20  }
 0x17d   :  { %324 = dma.done.wait [#allocation4], 256  }
 0x17e   :  { %325 = vsyncadd [#allocation4], 4294967040 }
 0x17f   :  { %175 = vsyncpa [#allocation3], 1 }
 0x180   :  { %176 = vsyncpa [#allocation4], 1 }

</bundles_post_ra>
